<compile_context>
chip_gen: v5e
topology: v5e:2x2
jax: 0.10.0
libtpu: 0.0.40
codegen_flags: <defaults>
</compile_context>

<pallas_src>
import functools

import jax
import jax.numpy as jnp
from jax import lax
from jax.experimental import pallas as pl
from jax.experimental.pallas import tpu as pltpu


# ----------------------------------------------------------------------------- config
def _query_vmem_capacity():
    cap = 64 * 1024 * 1024  # conservative default (v7x-sized) if the query fails
    try:
        info = pltpu.get_tpu_info()
        cap = int(getattr(info, "vmem_capacity_bytes", None) or cap)
    except Exception:
        pass
    return cap


_VMEM_CAP_BYTES = _query_vmem_capacity()
# Scoped VMEM limit: half of physical (32 MiB on v7x, 64 MiB on v5e/v6e).
_VMEM_LIMIT_BYTES = int(min(_VMEM_CAP_BYTES // 2, 64 * 1024 * 1024))
# Multiply streams in + out, 2-deep buffered (4 live blocks); reduction streams in only.
_MUL_BLOCK_BYTES = int(min(8 << 20, _VMEM_LIMIT_BYTES // 5))
_RED_BLOCK_BYTES = int(min(8 << 20, _VMEM_LIMIT_BYTES // 3))
_PALLAS_MIN_BYTES = 1 << 20   # below this, plain XLA beats two kernel launches
_NUM_SPLITS = 2               # partial-sum splits (shards the reduction across v7x's 2 TCs)


# ----------------------------------------------------------------------------- tiling
def _lane_dense_tiling(numel, itemsize, max_block_bytes):
    """Flatten `numel` elements (row-major order preserved) to (rows, width) with a
    lane-dense width (multiple of 128) and pick tile_rows so one (tile_rows, width)
    block is <= max_block_bytes.  Returns (rows, width, tile_rows), or None when the
    element count is not a multiple of 128 (caller falls back to plain XLA)."""
    width = None
    for cand in (2048, 1024, 512, 256, 128):
        if numel % cand == 0:
            width = cand
            break
    if width is None:
        # TODO(synk): pad + mask a Pallas path for non-multiple-of-128 element counts.
        return None
    rows = numel // width
    # Sublane packing granule: 8 for 4-byte, 16 for 2-byte, 32 for 1-byte dtypes.
    granule = max(8, 32 // max(int(itemsize), 1))
    if rows <= granule:
        return rows, width, rows  # single full-extent block (always layout-legal)
    target = max(granule, (max_block_bytes // (width * itemsize)) // granule * granule)
    tile_rows = min(target, (rows // granule) * granule)
    return rows, width, tile_rows


# ------------------------------------------------------------------- reduction kernel
def _zero_sum_pallas(x, tiling):
    """Partial sums of (x * 0) as an (n_splits, acc_rows, width) f32 array.

    sum(x*0) is exactly 0 for finite x; NaN/Inf propagate, matching (x*0+1).mean()
    once the wrapper applies  scale = total / numel + 1.
    """
    rows, width, tile_rows = tiling
    x2d = x.reshape(rows, width)
    n_tiles = pl.cdiv(rows, tile_rows)
    n_splits = min(_NUM_SPLITS, n_tiles)
    steps = pl.cdiv(n_tiles, n_splits)
    exact = (rows % tile_rows == 0) and (n_tiles % n_splits == 0)

    acc_rows = 8 if tile_rows % 8 == 0 else tile_rows  # non-multiple only for tiny rows
    n_fold = tile_rows // acc_rows

    def kernel(x_ref, psum_ref):
        j = pl.program_id(1)

        @pl.when(j == 0)
        def _():
            psum_ref[...] = jnp.zeros_like(psum_ref)

        # Keep the per-element x*0 form (NaN/Inf propagate; no sum(x) overflow risk).
        z = x_ref[...] * jnp.zeros((), x_ref.dtype)
        if not exact:
            # Mask rows past the end (edge block) and fully-duplicated clamped blocks.
            t = pl.program_id(0) * steps + j            # unclamped tile index
            row0 = t * tile_rows
            local = lax.broadcasted_iota(jnp.int32, (tile_rows, width), 0)
            z = jnp.where(row0 + local < rows, z, jnp.zeros((), z.dtype))
        if n_fold > 1:
            # Pure-VPU fold of the block into (acc_rows, width); no per-step XLU reduce.
            z = jnp.sum(z.reshape(n_fold, acc_rows, width), axis=0)
        psum_ref[...] += z.astype(jnp.float32)[None]

    if exact:
        x_map = lambda c, j: (c * steps + j, 0)
    else:
        x_map = lambda c, j: (jnp.minimum(c * steps + j, n_tiles - 1), 0)

    return pl.pallas_call(
        kernel,
        out_shape=jax.ShapeDtypeStruct((n_splits, acc_rows, width), jnp.float32),
        grid=(n_splits, steps),
        in_specs=[pl.BlockSpec((tile_rows, width), x_map)],
        out_specs=pl.BlockSpec((1, acc_rows, width), lambda c, j: (c, 0, 0)),
        compiler_params=pltpu.CompilerParams(
            dimension_semantics=("parallel", "arbitrary"),
            vmem_limit_bytes=_VMEM_LIMIT_BYTES,
        ),
    )(x2d)


# -------------------------------------------------------------------- multiply kernel
def _scale_outputs_pallas(outputs, scale, tiling):
    """outputs * scale[0], streamed through lane-dense tiles on a parallel grid."""
    rows, width, tile_rows = tiling
    out2d = outputs.reshape(rows, width)
    n_tiles = pl.cdiv(rows, tile_rows)

    def kernel(scale_ref, outs_ref, o_ref):
        s = scale_ref[0].astype(o_ref.dtype)   # cast the scalar, not the tensor
        o_ref[...] = outs_ref[...] * s

    # No input_output_aliases: aliasing a non-donated jit argument makes XLA insert a
    # defensive copy of the whole slab; a fresh output buffer is strictly cheaper.
    res2d = pl.pallas_call(
        kernel,
        out_shape=jax.ShapeDtypeStruct(out2d.shape, outputs.dtype),
        grid=(n_tiles,),
        in_specs=[
            pl.BlockSpec(memory_space=pltpu.MemorySpace.SMEM),   # (1,) f32 scale
            pl.BlockSpec((tile_rows, width), lambda i: (i, 0)),
        ],
        out_specs=pl.BlockSpec((tile_rows, width), lambda i: (i, 0)),
        compiler_params=pltpu.CompilerParams(
            dimension_semantics=("parallel",),
            vmem_limit_bytes=_VMEM_LIMIT_BYTES,
        ),
    )(scale, out2d)
    return res2d.reshape(outputs.shape)


# ----------------------------------------------------------------------------- forward
@functools.partial(jax.jit, static_argnames=("force_pallas",))
def aix_op_forward(x, outputs, force_pallas=False):
    """Pallas implementation of AIXOpLayer.forward(x) with stored `outputs`."""
    # TODO(synk): the module's Python-side bookkeeping (self.inputs, aix_graph_path
    # attrs) is host-side state with no device-kernel equivalent.
    x_bytes = x.size * x.dtype.itemsize
    out_bytes = outputs.size * outputs.dtype.itemsize

    x_tiling = _lane_dense_tiling(x.size, x.dtype.itemsize, _RED_BLOCK_BYTES)
    out_tiling = _lane_dense_tiling(outputs.size, outputs.dtype.itemsize, _MUL_BLOCK_BYTES)

    use_pallas_red = x_tiling is not None and (force_pallas or x_bytes >= _PALLAS_MIN_BYTES)
    use_pallas_mul = out_tiling is not None and (force_pallas or out_bytes >= _PALLAS_MIN_BYTES)

    if use_pallas_red:
        zsum = jnp.sum(_zero_sum_pallas(x, x_tiling))           # trivial combine of partials
    else:
        # Small / awkward shapes: plain XLA, keeping the per-element x*0 form.
        zsum = jnp.sum((x * jnp.zeros((), x.dtype)).astype(jnp.float32))
    # scale == (x*0+1).mean(): exactly 1.0 for finite x, NaN/Inf propagate.
    scale = (zsum * (1.0 / float(x.size)) + 1.0).reshape(1)

    if use_pallas_mul:
        return _scale_outputs_pallas(outputs, scale, out_tiling)
    return outputs * scale[0].astype(outputs.dtype)


# -------------------------------------------------------------------------------- main
if __name__ == "__main__":
    key = jax.random.PRNGKey(0)
    kx, ko, ka, kb = jax.random.split(key, 4)

    # Small NCHW shapes consistent with a conv-style AIX graph op.
    x = jax.random.normal(kx, (2, 4, 16, 16), dtype=jnp.float32)
    outputs = jax.random.normal(ko, (2, 4, 16, 16), dtype=jnp.float32)
    ref = outputs * jnp.mean(x * 0.0 + 1.0)

    # 1) Pallas path (forced; this small example would otherwise take the XLA fast path).
    res = aix_op_forward(x, outputs, force_pallas=True)
    jax.block_until_ready(res)
    assert res.shape == outputs.shape and res.dtype == outputs.dtype
    assert jnp.allclose(res, ref, atol=1e-6), "pallas path mismatch"

    # 2) Default path (small-tensor XLA fast path).
    res_small = aix_op_forward(x, outputs)
    jax.block_until_ready(res_small)
    assert jnp.allclose(res_small, ref, atol=1e-6), "fast path mismatch"

    # 3) NaN in x must propagate through (x*0+1).mean(), like PyTorch.
    x_nan = x.at[0, 0, 0, 0].set(jnp.nan)
    res_nan = aix_op_forward(x_nan, outputs, force_pallas=True)
    jax.block_until_ready(res_nan)
    assert bool(jnp.isnan(res_nan).all()), "NaN did not propagate"

    # 4) bf16 outputs: scalar is cast, data never round-trips through f32 -> exact.
    out_bf16 = jax.random.normal(ka, (2, 4, 16, 16)).astype(jnp.bfloat16)
    res_bf16 = aix_op_forward(x, out_bf16, force_pallas=True)
    jax.block_until_ready(res_bf16)
    assert bool((res_bf16 == out_bf16).all()), "bf16 path mismatch"

    # 5) Extra coverage at small size: multi-tile grid, masked edge block, clamped
    #    duplicate block, 2-way partial-sum split, and the sublane fold path.
    x5 = jax.random.normal(kb, (40, 128), dtype=jnp.float32)
    out5 = jax.random.normal(ko, (40, 128), dtype=jnp.float32)
    tiling5 = (40, 128, 16)                      # rows=40, width=128, tile_rows=16
    part5 = _zero_sum_pallas(x5, tiling5)
    scale5 = (jnp.sum(part5) * (1.0 / float(x5.size)) + 1.0).reshape(1)
    res5 = _scale_outputs_pallas(out5, scale5, tiling5)
    jax.block_until_ready(res5)
    assert jnp.allclose(res5, out5 * jnp.mean(x5 * 0.0 + 1.0), atol=1e-6), "edge-block mismatch"

    print("KERNEL_OK")
</pallas_src>

<mosaic_0001>
module attributes {stable_mosaic.version = 11 : i64} {
  func.func @kernel(%arg0: i32, %arg1: i32, %arg2: memref<1x2048xf32, #tpu.memory_space<vmem>>, %arg3: memref<1x1x2048xf32, #tpu.memory_space<vmem>>) attributes {dimension_semantics = [#tpu.dimension_semantics<parallel>, #tpu.dimension_semantics<arbitrary>], iteration_bounds = array<i64: 1, 1>, scalar_prefetch = 0 : i64, scratch_operands = 0 : i64, tpu.core_type = #tpu.core_type<tc>, window_params = [{transform_indices = @transform_0, window_bounds = array<i64: 1, 2048>}, {transform_indices = @transform_1, window_bounds = array<i64: 1, 1, 2048>}]} {
    %c0_i32 = arith.constant 0 : i32
    %0 = arith.cmpi eq, %arg1, %c0_i32 : i32
    %1 = arith.extui %0 : i1 to i32
    %c0_i32_0 = arith.constant 0 : i32
    %2 = arith.cmpi ne, %1, %c0_i32_0 : i32
    scf.if %2 {
      %cst_8 = arith.constant 0.000000e+00 : f32
      %10 = vector.broadcast %cst_8 : f32 to vector<1x1x2048xf32>
      %c0_9 = arith.constant 0 : index
      %c0_10 = arith.constant 0 : index
      %c0_11 = arith.constant 0 : index
      %11 = vector.load %arg3[%c0_9, %c0_10, %c0_11] : memref<1x1x2048xf32, #tpu.memory_space<vmem>>, vector<1x1x2048xf32>
      tpu.vector_store %arg3[%c0_9, %c0_10, %c0_11], %10 {strides = array<i32>} : memref<1x1x2048xf32, #tpu.memory_space<vmem>>, vector<1x1x2048xf32>,
    } else {
    }
    %c0 = arith.constant 0 : index
    %c0_1 = arith.constant 0 : index
    %3 = vector.load %arg2[%c0, %c0_1] : memref<1x2048xf32, #tpu.memory_space<vmem>>, vector<1x2048xf32>
    %cst = arith.constant 0.000000e+00 : f32
    %4 = vector.broadcast %cst : f32 to vector<1x2048xf32>
    %5 = arith.mulf %3, %4 : vector<1x2048xf32>
    %c0_2 = arith.constant 0 : index
    %c0_3 = arith.constant 0 : index
    %c0_4 = arith.constant 0 : index
    %6 = vector.load %arg3[%c0_2, %c0_3, %c0_4] : memref<1x1x2048xf32, #tpu.memory_space<vmem>>, vector<1x1x2048xf32>
    %7 = vector.shape_cast %5 : vector<1x2048xf32> to vector<1x1x2048xf32>
    %8 = arith.addf %6, %7 : vector<1x1x2048xf32>
    %c0_5 = arith.constant 0 : index
    %c0_6 = arith.constant 0 : index
    %c0_7 = arith.constant 0 : index
    %9 = vector.load %arg3[%c0_5, %c0_6, %c0_7] : memref<1x1x2048xf32, #tpu.memory_space<vmem>>, vector<1x1x2048xf32>
    tpu.vector_store %arg3[%c0_5, %c0_6, %c0_7], %8 {strides = array<i32>} : memref<1x1x2048xf32, #tpu.memory_space<vmem>>, vector<1x1x2048xf32>,
    return
  }
  func.func @transform_0(%arg0: i32, %arg1: i32) -> (i32, i32) {
    %c1_i32 = arith.constant 1 : i32
    %0 = arith.muli %arg0, %c1_i32 : i32
    %1 = arith.addi %0, %arg1 : i32
    %c0_i32 = arith.constant 0 : i32
    %c0_i32_0 = arith.constant 0 : i32
    return %1, %c0_i32 : i32, i32
  }
  func.func @transform_1(%arg0: i32, %arg1: i32) -> (i32, i32, i32) {
    %c0_i32 = arith.constant 0 : i32
    %c0_i32_0 = arith.constant 0 : i32
    %c0_i32_1 = arith.constant 0 : i32
    return %arg0, %c0_i32, %c0_i32_0 : i32, i32, i32
  }
}

module attributes {stable_mosaic.version = 11 : i64} {
  func.func @kernel(%arg0: i32, %arg1: memref<1xf32, #tpu.memory_space<smem>>, %arg2: memref<1x2048xf32, #tpu.memory_space<vmem>>, %arg3: memref<1x2048xf32, #tpu.memory_space<vmem>>) attributes {dimension_semantics = [#tpu.dimension_semantics<parallel>], iteration_bounds = array<i64: 1>, scalar_prefetch = 0 : i64, scratch_operands = 0 : i64, tpu.core_type = #tpu.core_type<tc>, window_params = [{transform_indices = @transform_0, window_bounds = array<i64: 1>}, {transform_indices = @transform_1, window_bounds = array<i64: 1, 2048>}, {transform_indices = @transform_2, window_bounds = array<i64: 1, 2048>}]} {
    %c0 = arith.constant 0 : index
    %0 = memref.load %arg1[%c0] : memref<1xf32, #tpu.memory_space<smem>>
    %c0_0 = arith.constant 0 : index
    %c0_1 = arith.constant 0 : index
    %1 = vector.load %arg2[%c0_0, %c0_1] : memref<1x2048xf32, #tpu.memory_space<vmem>>, vector<1x2048xf32>
    %2 = vector.broadcast %0 : f32 to vector<1x2048xf32>
    %3 = arith.mulf %1, %2 : vector<1x2048xf32>
    %c0_2 = arith.constant 0 : index
    %c0_3 = arith.constant 0 : index
    %4 = vector.load %arg3[%c0_2, %c0_3] : memref<1x2048xf32, #tpu.memory_space<vmem>>, vector<1x2048xf32>
    tpu.vector_store %arg3[%c0_2, %c0_3], %3 {strides = array<i32>} : memref<1x2048xf32, #tpu.memory_space<vmem>>, vector<1x2048xf32>,
    return
  }
  func.func @transform_0(%arg0: i32) -> i32 {
    %c0_i32 = arith.constant 0 : i32
    %c0_i32_0 = arith.constant 0 : i32
    return %c0_i32 : i32
  }
  func.func @transform_1(%arg0: i32) -> (i32, i32) {
    %c0_i32 = arith.constant 0 : i32
    %c0_i32_0 = arith.constant 0 : i32
    return %arg0, %c0_i32 : i32, i32
  }
  func.func @transform_2(%arg0: i32) -> (i32, i32) {
    %c0_i32 = arith.constant 0 : i32
    %c0_i32_0 = arith.constant 0 : i32
    return %arg0, %c0_i32 : i32, i32
  }
}

</mosaic_0001>

<bundles_post_ra>
// kernel: aix_op_forward.2
= control target key start
LH: loop header
LB: loop body
LE: loop exit
PB: predicated region body
PF: predicated region fallthrough
CT: control target
= control target key end

     0   :  { %s74_s0 = inlined_call_operand.vmem [shape: f32[1,2048], index: 0, kind: input, shape index: {}]   ;;  %s75_s1 = inlined_call_operand.vmem [shape: f32[1,1,2048], index: 1, kind: output, shape index: {}]  }
   0x1   :  { %v31_v0 = vld [vmem:[%s74_s0] sm:$0xff]  ;;  %v32_v1 = vld [vmem:[%s74_s0 + $0x8] sm:$0xff] }
   0x2   :  { %v33_v2 = vmul.f32 0.0, %v31_v0  ;;  %v34_v3 = vmul.f32 0.0, %v32_v1 }
   0x4   :  { %39 = vst [vmem:[%s75_s1] sm:$0xff] %v33_v2 }
   0x5   :  { %40 = vst [vmem:[%s75_s1 + $0x8] sm:$0xff] %v34_v3 }

// kernel: aix_op_forward.3
= control target key start
LH: loop header
LB: loop body
LE: loop exit
PB: predicated region body
PF: predicated region fallthrough
CT: control target
= control target key end

     0   :  { %s54_s0 = inlined_call_operand.<no memory space> [shape: f32[1], index: 0, kind: input, shape index: {}]   ;;  %s55_s1 = inlined_call_operand.vmem [shape: f32[1,2048], index: 1, kind: input, shape index: {}]   ;;  %s56_s2 = inlined_call_operand.vmem [shape: f32[1,2048], index: 2, kind: output, shape index: {}]  }
   0x1   :  { %v13_v0 = vld [vmem:[%s55_s1] sm:$0xff]  ;;  %v15_v1 = vstv %s54_s0  ;;  %v14_v2 = vld [vmem:[%s55_s1 + $0x8] sm:$0xff] }
   0x2   :  { %v16_v3 = vmul.f32 %v15_v1, %v13_v0  ;;  %v17_v4 = vmul.f32 %v15_v1, %v14_v2 }
   0x4   :  { %18 = vst [vmem:[%s56_s2] sm:$0xff] %v16_v3 }
   0x5   :  { %19 = vst [vmem:[%s56_s2 + $0x8] sm:$0xff] %v17_v4 }

</bundles_post_ra>
